<compile_context>
chip_gen: v6e
topology: v6e:2x2x1
jax: 0.10.0
libtpu: 0.0.40
codegen_flags: <defaults>
</compile_context>

<pallas_src>
import jax
import jax.numpy as jnp
from jax.experimental import pallas as pl
from jax.experimental.pallas import tpu as pltpu

EPS = 1e-5
LANE = 128


def _round_up(x, m):
    return (x + m - 1) // m * m


def _cdiv(a, b):
    return (a + b - 1) // b


def _vmem_limit(working_bytes):
    """Per-chip VMEM cap: v7x has 64 MiB/TC, so clamp lower there."""
    try:
        cap = int(getattr(pltpu.get_tpu_info(), "vmem_capacity_bytes", 128 << 20))
    except Exception:
        cap = 128 << 20
    hard = (40 << 20) if cap <= (64 << 20) else (48 << 20)
    return int(min(max(2 * working_bytes, 8 << 20), hard))


# --------------------------------------------------------------------------
# Kernel 1: im2col matmul (bf16 in -> f32 acc -> bf16 out) with BN partial
#           statistics fused into the epilogue of the K reduction.
# --------------------------------------------------------------------------
def _mm_stats_kernel_1k(a_ref, b_ref, o_ref, sum_ref, ssq_ref):
    # Single K tile: no scratch accumulator, no zero-init, no epilogue copy.
    acc = jnp.dot(a_ref[...], b_ref[...], preferred_element_type=jnp.float32)
    o_ref[...] = acc.astype(o_ref.dtype)
    sum_ref[...] = jnp.sum(acc, axis=0, keepdims=True)[None]
    ssq_ref[...] = jnp.sum(acc * acc, axis=0, keepdims=True)[None]


def _mm_stats_kernel_nk(a_ref, b_ref, o_ref, sum_ref, ssq_ref, acc_ref):
    k = pl.program_id(1)

    @pl.when(k == 0)
    def _():
        acc_ref[...] = jnp.zeros_like(acc_ref)

    acc_ref[...] += jnp.dot(a_ref[...], b_ref[...],
                            preferred_element_type=jnp.float32)

    @pl.when(k == pl.num_programs(1) - 1)
    def _():
        acc = acc_ref[...]
        o_ref[...] = acc.astype(o_ref.dtype)
        sum_ref[...] = jnp.sum(acc, axis=0, keepdims=True)[None]
        ssq_ref[...] = jnp.sum(acc * acc, axis=0, keepdims=True)[None]


def conv_matmul_with_stats(a, b, c_pad, tm_default=512):
    """a:(M,K), b:(K,Cout) -> raw:(Mp,c_pad) bf16, per-tile sum/sumsq f32, Mp, tm."""
    M, K = a.shape
    cout = b.shape[1]

    # Large streaming M tiles; keep >=2 tiles when possible so the "parallel"
    # axis shards across both v7x TensorCores; multiple of 16 for bf16 packing.
    if M >= 2 * tm_default:
        tm = tm_default
    else:
        tm = max(16, _round_up(_cdiv(M, 2), 16))
    Mp = _round_up(M, tm)
    Mt = Mp // tm

    Kp = _round_up(K, LANE)
    if Kp <= 512:
        tk = Kp
    elif Kp % 512 == 0:
        tk = 512
    elif Kp % 256 == 0:
        tk = 256
    else:
        tk = LANE
    Kt = Kp // tk

    # bf16 pads (no f32 pad slab; zero rows/cols contribute 0 to the stats).
    a_p = jnp.pad(a.astype(jnp.bfloat16), ((0, Mp - M), (0, Kp - K)))
    b_p = jnp.pad(b.astype(jnp.bfloat16), ((0, Kp - K), (0, c_pad - cout)))

    vmem_bytes = (2 * tm * tk * 2 + 2 * tk * c_pad * 2     # A, B (bf16, dbl-buf)
                  + 2 * tm * c_pad * 2 + 4 * c_pad * 4     # raw out + stats
                  + (tm * c_pad * 4 if Kt > 1 else 0))     # f32 acc scratch
    vmem_limit = _vmem_limit(vmem_bytes)

    out_shape = (
        jax.ShapeDtypeStruct((Mp, c_pad), jnp.bfloat16),
        jax.ShapeDtypeStruct((Mt, 1, c_pad), jnp.float32),
        jax.ShapeDtypeStruct((Mt, 1, c_pad), jnp.float32),
    )

    if Kt == 1:
        raw, sums, ssq = pl.pallas_call(
            _mm_stats_kernel_1k,
            out_shape=out_shape,
            grid=(Mt,),
            in_specs=[
                pl.BlockSpec((tm, tk), lambda i: (i, 0)),
                pl.BlockSpec((tk, c_pad), lambda i: (0, 0)),
            ],
            out_specs=(
                pl.BlockSpec((tm, c_pad), lambda i: (i, 0)),
                pl.BlockSpec((1, 1, c_pad), lambda i: (i, 0, 0)),
                pl.BlockSpec((1, 1, c_pad), lambda i: (i, 0, 0)),
            ),
            compiler_params=pltpu.CompilerParams(
                dimension_semantics=("parallel",),
                vmem_limit_bytes=vmem_limit),
        )(a_p, b_p)
    else:
        raw, sums, ssq = pl.pallas_call(
            _mm_stats_kernel_nk,
            out_shape=out_shape,
            grid=(Mt, Kt),
            in_specs=[
                pl.BlockSpec((tm, tk), lambda i, k: (i, k)),
                pl.BlockSpec((tk, c_pad), lambda i, k: (k, 0)),
            ],
            out_specs=(
                pl.BlockSpec((tm, c_pad), lambda i, k: (i, 0)),
                pl.BlockSpec((1, 1, c_pad), lambda i, k: (i, 0, 0)),
                pl.BlockSpec((1, 1, c_pad), lambda i, k: (i, 0, 0)),
            ),
            scratch_shapes=[pltpu.VMEM((tm, c_pad), jnp.float32)],
            compiler_params=pltpu.CompilerParams(
                dimension_semantics=("parallel", "arbitrary"),
                vmem_limit_bytes=vmem_limit),
        )(a_p, b_p)
    return raw, sums, ssq, Mp, tm


# --------------------------------------------------------------------------
# Kernel 2: tiled BN-apply (scale/shift) + ReLU [+ residual add]
#           (bf16 inputs upcast in-kernel; lane-dense Cp output)
# --------------------------------------------------------------------------
def _scale_relu_kernel(x_ref, sc_ref, sh_ref, o_ref):
    y = x_ref[...].astype(jnp.float32) * sc_ref[...] + sh_ref[...]
    o_ref[...] = jnp.maximum(y, 0.0).astype(o_ref.dtype)


def _scale_add_relu_kernel(x_ref, id_ref, sc_ref, sh_ref, o_ref):
    y = (x_ref[...].astype(jnp.float32) * sc_ref[...] + sh_ref[...]
         + id_ref[...].astype(jnp.float32))
    o_ref[...] = jnp.maximum(y, 0.0).astype(o_ref.dtype)


def bn_apply(raw, scale, shift, conv_tm, identity=None, out_dtype=jnp.float32,
             target_rows=1024):
    Mp, Cp = raw.shape
    Mt = Mp // conv_tm
    # Streaming tile independent of the matmul tile; ~1024 rows, but keep at
    # least 2 grid steps when possible (v7x megacore).
    per = max(1, min(target_rows // max(conv_tm, 1), Mt))
    if Mt >= 2:
        per = max(1, min(per, Mt // 2))
    while Mt % per:
        per -= 1
    tr = per * conv_tm
    grid = (Mp // tr,)

    x_spec = pl.BlockSpec((tr, Cp), lambda i: (i, 0))
    v_spec = pl.BlockSpec((1, Cp), lambda i: (0, 0))
    n_in_slabs = 2 if identity is not None else 1
    bpe_out = jnp.dtype(out_dtype).itemsize
    vmem_bytes = 2 * tr * Cp * (2 * n_in_slabs + bpe_out) + 4 * Cp * 4
    params = pltpu.CompilerParams(dimension_semantics=("parallel",),
                                  vmem_limit_bytes=_vmem_limit(vmem_bytes))
    if identity is None:
        return pl.pallas_call(
            _scale_relu_kernel,
            out_shape=jax.ShapeDtypeStruct((Mp, Cp), out_dtype),
            grid=grid,
            in_specs=[x_spec, v_spec, v_spec],
            out_specs=x_spec,
            compiler_params=params,
        )(raw, scale, shift)
    return pl.pallas_call(
        _scale_add_relu_kernel,
        out_shape=jax.ShapeDtypeStruct((Mp, Cp), out_dtype),
        grid=grid,
        in_specs=[x_spec, x_spec, v_spec, v_spec],
        out_specs=x_spec,
        compiler_params=params,
    )(raw, identity, scale, shift)


# --------------------------------------------------------------------------
# small JAX glue
# --------------------------------------------------------------------------
def _bn_scale_shift(sums, ssq, count, gamma, beta, c_pad):
    """Finalize batch stats (tiny (Mt,1,Cp) tensors) -> per-lane scale/shift."""
    cout = gamma.shape[0]
    s = jnp.sum(sums, axis=(0, 1))
    sq = jnp.sum(ssq, axis=(0, 1))
    mean = s / count
    var = jnp.maximum(sq / count - mean * mean, 0.0)   # biased (training-mode) var
    g = jnp.pad(gamma.astype(jnp.float32), (0, c_pad - cout))
    b = jnp.pad(beta.astype(jnp.float32), (0, c_pad - cout))
    scale = g * jax.lax.rsqrt(var + EPS)
    shift = b - mean * scale
    return scale.reshape(1, c_pad), shift.reshape(1, c_pad)


def _im2col(x_nhwc, stride):
    """3x3, pad=1, given stride -> (N*Ho*Wo, 9*C) rows ordered (kh, kw, c)."""
    N, H, W, C = x_nhwc.shape
    xp = jnp.pad(x_nhwc, ((0, 0), (1, 1), (1, 1), (0, 0)))
    Ho = (H - 1) // stride + 1
    Wo = (W - 1) // stride + 1
    cols = []
    for kh in range(3):
        for kw in range(3):
            cols.append(xp[:, kh:kh + (Ho - 1) * stride + 1:stride,
                              kw:kw + (Wo - 1) * stride + 1:stride, :])
    patches = jnp.stack(cols, axis=3)            # (N, Ho, Wo, 9, C)
    return patches.reshape(N * Ho * Wo, 9 * C), (N, Ho, Wo)


def pyr_block_forward(x_nchw, params, stride):
    """Pallas implementation of PyrBlock.forward.  x_nchw: (N, Cin, H, W) f32."""
    w1 = params["w1"].astype(jnp.bfloat16)   # (3,3,Cin,Cout) HWIO
    w2 = params["w2"].astype(jnp.bfloat16)   # (3,3,Cout,Cout)
    g1, b1, g2, b2 = params["g1"], params["b1"], params["g2"], params["b2"]
    Cin, Cout = w1.shape[2], w1.shape[3]
    Cp = _round_up(Cout, LANE)   # lane-dense outputs; 256-alignment only once MXU-bound

    # bf16 NHWC activation: all im2col / pad glue streams half the bytes.
    x = jnp.transpose(x_nchw, (0, 2, 3, 1)).astype(jnp.bfloat16)

    # conv1 (stride s) with BN1 statistics fused into the matmul epilogue
    p1, (N, Ho, Wo) = _im2col(x, stride)
    M = N * Ho * Wo
    raw1, s1, q1, Mp1, tm1 = conv_matmul_with_stats(p1, w1.reshape(9 * Cin, Cout), Cp)
    sc1, sh1 = _bn_scale_shift(s1, q1, M, g1, b1, Cp)
    # y1 kept bf16 so conv2's im2col / A-pad also run in bf16.
    y1 = bn_apply(raw1, sc1, sh1, tm1, out_dtype=jnp.bfloat16)
    y1 = y1[:M, :Cout].reshape(N, Ho, Wo, Cout)

    # conv2 (stride 1) with BN2 statistics fused into the matmul epilogue
    p2, _ = _im2col(y1, 1)
    raw2, s2, q2, Mp2, tm2 = conv_matmul_with_stats(p2, w2.reshape(9 * Cout, Cout), Cp)
    sc2, sh2 = _bn_scale_shift(s2, q2, M, g2, b2, Cp)

    # shortcut: avg_pool2d(kernel=1, stride=s) == spatial subsample; zero-extend
    # channels to the lane-padded width.  Slab kept bf16 (upcast in-kernel).
    if stride != 1 or Cin != Cout:
        identity = x[:, ::stride, ::stride, :]
    else:
        identity = x
    identity = identity.reshape(M, identity.shape[-1])
    identity = jnp.pad(identity, ((0, Mp2 - M), (0, Cp - identity.shape[-1])))

    out = bn_apply(raw2, sc2, sh2, tm2, identity=identity)  # BN2 + add + ReLU (f32 out)
    out = out[:M, :Cout].reshape(N, Ho, Wo, Cout)
    return jnp.transpose(out, (0, 3, 1, 2))                  # back to NCHW


# --------------------------- pure-JAX reference ------------------------------
def reference_forward(x_nchw, params, stride):
    x = jnp.transpose(x_nchw, (0, 2, 3, 1)).astype(jnp.float32)

    def conv(x, w, s):
        return jax.lax.conv_general_dilated(
            x, w, (s, s), ((1, 1), (1, 1)),
            dimension_numbers=("NHWC", "HWIO", "NHWC"))

    def bn_train(x, g, b):
        mean = jnp.mean(x, axis=(0, 1, 2), keepdims=True)
        var = jnp.mean((x - mean) ** 2, axis=(0, 1, 2), keepdims=True)
        return (x - mean) * jax.lax.rsqrt(var + EPS) * g + b

    out = jax.nn.relu(bn_train(conv(x, params["w1"], stride), params["g1"], params["b1"]))
    out = bn_train(conv(out, params["w2"], 1), params["g2"], params["b2"])
    Cin, Cout = x.shape[-1], out.shape[-1]
    if stride != 1 or Cin != Cout:
        identity = x[:, ::stride, ::stride, :]
        identity = jnp.pad(identity, ((0, 0), (0, 0), (0, 0), (0, Cout - Cin)))
    else:
        identity = x
    out = jax.nn.relu(out + identity)
    return jnp.transpose(out, (0, 3, 1, 2))


# --------------------------------- main --------------------------------------
if __name__ == "__main__":
    in_channels, out_channels, stride = 4, 8, 2
    N, H, W = 2, 16, 16

    key = jax.random.PRNGKey(0)
    k_x, k_w1, k_w2, k_g1, k_b1, k_g2, k_b2 = jax.random.split(key, 7)

    x = jax.random.normal(k_x, (N, in_channels, H, W), dtype=jnp.float32)

    params = {
        # conv weights in HWIO layout (3,3,Cin,Cout); PyTorch OIHW would transpose to this
        "w1": 0.1 * jax.random.normal(k_w1, (3, 3, in_channels, out_channels), jnp.float32),
        "w2": 0.1 * jax.random.normal(k_w2, (3, 3, out_channels, out_channels), jnp.float32),
        "g1": 1.0 + 0.1 * jax.random.normal(k_g1, (out_channels,), jnp.float32),
        "b1": 0.1 * jax.random.normal(k_b1, (out_channels,), jnp.float32),
        "g2": 1.0 + 0.1 * jax.random.normal(k_g2, (out_channels,), jnp.float32),
        "b2": 0.1 * jax.random.normal(k_b2, (out_channels,), jnp.float32),
    }

    fwd = jax.jit(pyr_block_forward, static_argnums=2)
    out = jax.block_until_ready(fwd(x, params, stride))
    ref = jax.block_until_ready(reference_forward(x, params, stride))

    assert out.shape == (N, out_channels, H // stride, W // stride), out.shape
    assert jnp.all(jnp.isfinite(out))
    # bf16 MXU inputs + bf16 intermediates (f32 accumulation/stats) -> looser
    # tolerance than pure f32.
    assert jnp.allclose(out, ref, rtol=2e-2, atol=4e-2), float(jnp.max(jnp.abs(out - ref)))

    print("KERNEL_OK")
</pallas_src>

<mosaic_0001>
module attributes {stable_mosaic.version = 11 : i64} {
  func.func @_mm_stats_kernel_1k(%arg0: i32, %arg1: memref<64x128xbf16, #tpu.memory_space<vmem>>, %arg2: memref<128x128xbf16, #tpu.memory_space<vmem>>, %arg3: memref<64x128xbf16, #tpu.memory_space<vmem>>, %arg4: memref<1x1x128xf32, #tpu.memory_space<vmem>>, %arg5: memref<1x1x128xf32, #tpu.memory_space<vmem>>) attributes {dimension_semantics = [#tpu.dimension_semantics<parallel>], iteration_bounds = array<i64: 2>, scalar_prefetch = 0 : i64, scratch_operands = 0 : i64, tpu.core_type = #tpu.core_type<tc>, window_params = [{transform_indices = @transform_0, window_bounds = array<i64: 64, 128>}, {pipeline_mode = #tpu.pipeline_mode<synchronous>, transform_indices = @transform_1, window_bounds = array<i64: 128, 128>}, {transform_indices = @transform_2, window_bounds = array<i64: 64, 128>}, {transform_indices = @transform_3, window_bounds = array<i64: 1, 1, 128>}, {transform_indices = @transform_4, window_bounds = array<i64: 1, 1, 128>}]} {
    %c0 = arith.constant 0 : index
    %c0_0 = arith.constant 0 : index
    %0 = vector.load %arg1[%c0, %c0_0] : memref<64x128xbf16, #tpu.memory_space<vmem>>, vector<64x128xbf16>
    %c0_1 = arith.constant 0 : index
    %c0_2 = arith.constant 0 : index
    %1 = vector.load %arg2[%c0_1, %c0_2] : memref<128x128xbf16, #tpu.memory_space<vmem>>, vector<128x128xbf16>
    %cst = arith.constant dense<0.000000e+00> : vector<64x128xf32>
    %2 = tpu.matmul %0, %1, %cst {dimension_numbers = #tpu.dot_dimension_numbers<[1], [0], [0], [1], [0, 0, 1, 1], [], []>} : vector<64x128xbf16>, vector<128x128xbf16>, vector<64x128xf32> -> vector<64x128xf32>
    %3 = arith.truncf %2 : vector<64x128xf32> to vector<64x128xbf16>
    %c0_3 = arith.constant 0 : index
    %c0_4 = arith.constant 0 : index
    %4 = vector.load %arg3[%c0_3, %c0_4] : memref<64x128xbf16, #tpu.memory_space<vmem>>, vector<64x128xbf16>
    tpu.vector_store %arg3[%c0_3, %c0_4], %3 {strides = array<i32>} : memref<64x128xbf16, #tpu.memory_space<vmem>>, vector<64x128xbf16>,
    %cst_5 = arith.constant dense<0.000000e+00> : vector<128xf32>
    %5 = vector.multi_reduction <add>, %2, %cst_5 [0] : vector<64x128xf32> to vector<128xf32>
    %6 = vector.shape_cast %5 : vector<128xf32> to vector<1x128xf32>
    %7 = vector.shape_cast %6 : vector<1x128xf32> to vector<1x1x128xf32>
    %c0_6 = arith.constant 0 : index
    %c0_7 = arith.constant 0 : index
    %c0_8 = arith.constant 0 : index
    %8 = vector.load %arg4[%c0_6, %c0_7, %c0_8] : memref<1x1x128xf32, #tpu.memory_space<vmem>>, vector<1x1x128xf32>
    tpu.vector_store %arg4[%c0_6, %c0_7, %c0_8], %7 {strides = array<i32>} : memref<1x1x128xf32, #tpu.memory_space<vmem>>, vector<1x1x128xf32>,
    %9 = arith.mulf %2, %2 : vector<64x128xf32>
    %cst_9 = arith.constant dense<0.000000e+00> : vector<128xf32>
    %10 = vector.multi_reduction <add>, %9, %cst_9 [0] : vector<64x128xf32> to vector<128xf32>
    %11 = vector.shape_cast %10 : vector<128xf32> to vector<1x128xf32>
    %12 = vector.shape_cast %11 : vector<1x128xf32> to vector<1x1x128xf32>
    %c0_10 = arith.constant 0 : index
    %c0_11 = arith.constant 0 : index
    %c0_12 = arith.constant 0 : index
    %13 = vector.load %arg5[%c0_10, %c0_11, %c0_12] : memref<1x1x128xf32, #tpu.memory_space<vmem>>, vector<1x1x128xf32>
    tpu.vector_store %arg5[%c0_10, %c0_11, %c0_12], %12 {strides = array<i32>} : memref<1x1x128xf32, #tpu.memory_space<vmem>>, vector<1x1x128xf32>,
    return
  }
  func.func @transform_0(%arg0: i32) -> (i32, i32) {
    %c0_i32 = arith.constant 0 : i32
    %c0_i32_0 = arith.constant 0 : i32
    return %arg0, %c0_i32 : i32, i32
  }
  func.func @transform_1(%arg0: i32) -> (i32, i32) {
    %c0_i32 = arith.constant 0 : i32
    %c0_i32_0 = arith.constant 0 : i32
    %c0_i32_1 = arith.constant 0 : i32
    return %c0_i32, %c0_i32_0 : i32, i32
  }
  func.func @transform_2(%arg0: i32) -> (i32, i32) {
    %c0_i32 = arith.constant 0 : i32
    %c0_i32_0 = arith.constant 0 : i32
    return %arg0, %c0_i32 : i32, i32
  }
  func.func @transform_3(%arg0: i32) -> (i32, i32, i32) {
    %c0_i32 = arith.constant 0 : i32
    %c0_i32_0 = arith.constant 0 : i32
    %c0_i32_1 = arith.constant 0 : i32
    return %arg0, %c0_i32, %c0_i32_0 : i32, i32, i32
  }
  func.func @transform_4(%arg0: i32) -> (i32, i32, i32) {
    %c0_i32 = arith.constant 0 : i32
    %c0_i32_0 = arith.constant 0 : i32
    %c0_i32_1 = arith.constant 0 : i32
    return %arg0, %c0_i32, %c0_i32_0 : i32, i32, i32
  }
}

module attributes {stable_mosaic.version = 11 : i64} {
  func.func @_scale_relu_kernel(%arg0: i32, %arg1: memref<64x128xbf16, #tpu.memory_space<vmem>>, %arg2: memref<1x128xf32, #tpu.memory_space<vmem>>, %arg3: memref<1x128xf32, #tpu.memory_space<vmem>>, %arg4: memref<64x128xbf16, #tpu.memory_space<vmem>>) attributes {dimension_semantics = [#tpu.dimension_semantics<parallel>], iteration_bounds = array<i64: 2>, scalar_prefetch = 0 : i64, scratch_operands = 0 : i64, tpu.core_type = #tpu.core_type<tc>, window_params = [{transform_indices = @transform_0, window_bounds = array<i64: 64, 128>}, {pipeline_mode = #tpu.pipeline_mode<synchronous>, transform_indices = @transform_1, window_bounds = array<i64: 1, 128>}, {pipeline_mode = #tpu.pipeline_mode<synchronous>, transform_indices = @transform_2, window_bounds = array<i64: 1, 128>}, {transform_indices = @transform_3, window_bounds = array<i64: 64, 128>}]} {
    %c0 = arith.constant 0 : index
    %c0_0 = arith.constant 0 : index
    %0 = vector.load %arg1[%c0, %c0_0] : memref<64x128xbf16, #tpu.memory_space<vmem>>, vector<64x128xbf16>
    %1 = arith.extf %0 : vector<64x128xbf16> to vector<64x128xf32>
    %c0_1 = arith.constant 0 : index
    %c0_2 = arith.constant 0 : index
    %2 = vector.load %arg2[%c0_1, %c0_2] : memref<1x128xf32, #tpu.memory_space<vmem>>, vector<1x128xf32>
    %3 = vector.broadcast %2 : vector<1x128xf32> to vector<64x128xf32>
    %4 = arith.mulf %1, %3 : vector<64x128xf32>
    %c0_3 = arith.constant 0 : index
    %c0_4 = arith.constant 0 : index
    %5 = vector.load %arg3[%c0_3, %c0_4] : memref<1x128xf32, #tpu.memory_space<vmem>>, vector<1x128xf32>
    %6 = vector.broadcast %5 : vector<1x128xf32> to vector<64x128xf32>
    %7 = arith.addf %4, %6 : vector<64x128xf32>
    %cst = arith.constant 0.000000e+00 : f32
    %8 = vector.broadcast %cst : f32 to vector<64x128xf32>
    %9 = arith.maximumf %7, %8 : vector<64x128xf32>
    %10 = arith.truncf %9 : vector<64x128xf32> to vector<64x128xbf16>
    %c0_5 = arith.constant 0 : index
    %c0_6 = arith.constant 0 : index
    %11 = vector.load %arg4[%c0_5, %c0_6] : memref<64x128xbf16, #tpu.memory_space<vmem>>, vector<64x128xbf16>
    tpu.vector_store %arg4[%c0_5, %c0_6], %10 {strides = array<i32>} : memref<64x128xbf16, #tpu.memory_space<vmem>>, vector<64x128xbf16>,
    return
  }
  func.func @transform_0(%arg0: i32) -> (i32, i32) {
    %c0_i32 = arith.constant 0 : i32
    %c0_i32_0 = arith.constant 0 : i32
    return %arg0, %c0_i32 : i32, i32
  }
  func.func @transform_1(%arg0: i32) -> (i32, i32) {
    %c0_i32 = arith.constant 0 : i32
    %c0_i32_0 = arith.constant 0 : i32
    %c0_i32_1 = arith.constant 0 : i32
    return %c0_i32, %c0_i32_0 : i32, i32
  }
  func.func @transform_2(%arg0: i32) -> (i32, i32) {
    %c0_i32 = arith.constant 0 : i32
    %c0_i32_0 = arith.constant 0 : i32
    %c0_i32_1 = arith.constant 0 : i32
    return %c0_i32, %c0_i32_0 : i32, i32
  }
  func.func @transform_3(%arg0: i32) -> (i32, i32) {
    %c0_i32 = arith.constant 0 : i32
    %c0_i32_0 = arith.constant 0 : i32
    return %arg0, %c0_i32 : i32, i32
  }
}

module attributes {stable_mosaic.version = 11 : i64} {
  func.func @_scale_add_relu_kernel(%arg0: i32, %arg1: memref<64x128xbf16, #tpu.memory_space<vmem>>, %arg2: memref<64x128xbf16, #tpu.memory_space<vmem>>, %arg3: memref<1x128xf32, #tpu.memory_space<vmem>>, %arg4: memref<1x128xf32, #tpu.memory_space<vmem>>, %arg5: memref<64x128xf32, #tpu.memory_space<vmem>>) attributes {dimension_semantics = [#tpu.dimension_semantics<parallel>], iteration_bounds = array<i64: 2>, scalar_prefetch = 0 : i64, scratch_operands = 0 : i64, tpu.core_type = #tpu.core_type<tc>, window_params = [{transform_indices = @transform_0, window_bounds = array<i64: 64, 128>}, {transform_indices = @transform_1, window_bounds = array<i64: 64, 128>}, {pipeline_mode = #tpu.pipeline_mode<synchronous>, transform_indices = @transform_2, window_bounds = array<i64: 1, 128>}, {pipeline_mode = #tpu.pipeline_mode<synchronous>, transform_indices = @transform_3, window_bounds = array<i64: 1, 128>}, {transform_indices = @transform_4, window_bounds = array<i64: 64, 128>}]} {
    %c0 = arith.constant 0 : index
    %c0_0 = arith.constant 0 : index
    %0 = vector.load %arg1[%c0, %c0_0] : memref<64x128xbf16, #tpu.memory_space<vmem>>, vector<64x128xbf16>
    %1 = arith.extf %0 : vector<64x128xbf16> to vector<64x128xf32>
    %c0_1 = arith.constant 0 : index
    %c0_2 = arith.constant 0 : index
    %2 = vector.load %arg3[%c0_1, %c0_2] : memref<1x128xf32, #tpu.memory_space<vmem>>, vector<1x128xf32>
    %3 = vector.broadcast %2 : vector<1x128xf32> to vector<64x128xf32>
    %4 = arith.mulf %1, %3 : vector<64x128xf32>
    %c0_3 = arith.constant 0 : index
    %c0_4 = arith.constant 0 : index
    %5 = vector.load %arg4[%c0_3, %c0_4] : memref<1x128xf32, #tpu.memory_space<vmem>>, vector<1x128xf32>
    %6 = vector.broadcast %5 : vector<1x128xf32> to vector<64x128xf32>
    %7 = arith.addf %4, %6 : vector<64x128xf32>
    %c0_5 = arith.constant 0 : index
    %c0_6 = arith.constant 0 : index
    %8 = vector.load %arg2[%c0_5, %c0_6] : memref<64x128xbf16, #tpu.memory_space<vmem>>, vector<64x128xbf16>
    %9 = arith.extf %8 : vector<64x128xbf16> to vector<64x128xf32>
    %10 = arith.addf %7, %9 : vector<64x128xf32>
    %cst = arith.constant 0.000000e+00 : f32
    %11 = vector.broadcast %cst : f32 to vector<64x128xf32>
    %12 = arith.maximumf %10, %11 : vector<64x128xf32>
    %c0_7 = arith.constant 0 : index
    %c0_8 = arith.constant 0 : index
    %13 = vector.load %arg5[%c0_7, %c0_8] : memref<64x128xf32, #tpu.memory_space<vmem>>, vector<64x128xf32>
    tpu.vector_store %arg5[%c0_7, %c0_8], %12 {strides = array<i32>} : memref<64x128xf32, #tpu.memory_space<vmem>>, vector<64x128xf32>,
    return
  }
  func.func @transform_0(%arg0: i32) -> (i32, i32) {
    %c0_i32 = arith.constant 0 : i32
    %c0_i32_0 = arith.constant 0 : i32
    return %arg0, %c0_i32 : i32, i32
  }
  func.func @transform_1(%arg0: i32) -> (i32, i32) {
    %c0_i32 = arith.constant 0 : i32
    %c0_i32_0 = arith.constant 0 : i32
    return %arg0, %c0_i32 : i32, i32
  }
  func.func @transform_2(%arg0: i32) -> (i32, i32) {
    %c0_i32 = arith.constant 0 : i32
    %c0_i32_0 = arith.constant 0 : i32
    %c0_i32_1 = arith.constant 0 : i32
    return %c0_i32, %c0_i32_0 : i32, i32
  }
  func.func @transform_3(%arg0: i32) -> (i32, i32) {
    %c0_i32 = arith.constant 0 : i32
    %c0_i32_0 = arith.constant 0 : i32
    %c0_i32_1 = arith.constant 0 : i32
    return %c0_i32, %c0_i32_0 : i32, i32
  }
  func.func @transform_4(%arg0: i32) -> (i32, i32) {
    %c0_i32 = arith.constant 0 : i32
    %c0_i32_0 = arith.constant 0 : i32
    return %arg0, %c0_i32 : i32, i32
  }
}

</mosaic_0001>

<bundles_post_ra>
// kernel: pyr_block_forward.5
= control target key start
LH: loop header
LB: loop body
LE: loop exit
PB: predicated region body
PF: predicated region fallthrough
CT: control target
= control target key end

     0   :  { %s431_s12 = smov 0   ;;  %s461_s0 = inlined_call_operand.vmem [shape: bf16[128,128], index: 0, kind: input, shape index: {}]   ;;  %s462_s1 = inlined_call_operand.vmem [shape: f32[1,128], index: 1, kind: input, shape index: {}]   ;;  %s463_s2 = inlined_call_operand.vmem [shape: f32[1,128], index: 2, kind: input, shape index: {}]   ;;  %s464_s3 = inlined_call_operand.vmem [shape: bf16[128,128], index: 3, kind: output, shape index: {}]  }
   0x1 LB: > { %s324_s13 = sadd.s32 4294967295, %s409_s12   ;;  %p328_p0 = scmp.ge.s32.totalorder %s409_s12, 1  ;;  %s409_s12 = sphi %s431_s12, %s13_s12  }
   0x2   : > { %p138_p1 = scmp.lt.s32.totalorder %s409_s12, 3 }
   0x4   : > { %p139_p2 = pnand %p328_p0, %p138_p1 }
   0x5   : > { %s329_s14 = sshll.u32 (!%p139_p2), %s324_s13, 3 }
   0x6   : > { %142 = sbr.rel (%p139_p2) target bundleno = 27 (0x1b), region = 32  ;;  %p163_p3 = scmp.lt.s32.totalorder (!%p139_p2), %s329_s14, 15 }
   0xb   : > { %s466_s14 = smov (!%p163_p3, %s329_s14), 15  ;;  %v333_v0 = vld [vmem:[%s462_s1] ss:$0 sm:$0xff] }
   0xc   : > { %s330_s15 = sshll.u32 %s466_s14, 2  ;;  %v334_v9 = vld [vmem:[%s463_s2] ss:$0 sm:$0xff] }
   0xd   : > { %s166_s18 = scalar_lea.vmem %s461_s0, %s330_s15  ;;  %s172_s25 = scalar_lea.vmem %s464_s3, %s330_s15 }
   0xe   : > { %v354_v1 = vld [vmem:[%s166_s18] sm:$0xff]   ;;  %v389_v2 = vld [vmem:[%s166_s18 + $0x8] sm:$0xff]   ;;  %v390_v3 = vld [vmem:[%s166_s18 + $0x10] sm:$0xff]  }
   0xf   : > { %v355_v4 = vunpack.c.l.bf16 %v354_v1  ;;  %v356_v5 = vunpack.c.h.bf16 %v354_v1  ;;  %v359_v6 = vunpack.c.l.bf16 %v389_v2  ;;  %v360_v7 = vunpack.c.h.bf16 %v389_v2  ;;  %v391_v8 = vld [vmem:[%s166_s18 + $0x18] sm:$0xff]  }
  0x10   : > { %v363_v10 = vunpack.c.l.bf16 %v390_v3  ;;  %v364_v11 = vunpack.c.h.bf16 %v390_v3  ;;  %v367_v12 = vunpack.c.l.bf16 %v391_v8  ;;  %v368_v13 = vunpack.c.h.bf16 %v391_v8 }
  0x11   : > { %v197_v14 = vmul.f32 %v355_v4, %v333_v0  ;;  %v198_v15 = vmul.f32 %v356_v5, %v333_v0  ;;  %v199_v16 = vmul.f32 %v359_v6, %v333_v0  ;;  %v200_v17 = vmul.f32 %v360_v7, %v333_v0 }
  0x12   : > { %v201_v18 = vmul.f32 %v363_v10, %v333_v0  ;;  %v202_v19 = vmul.f32 %v364_v11, %v333_v0  ;;  %v203_v20 = vmul.f32 %v367_v12, %v333_v0  ;;  %v204_v21 = vmul.f32 %v368_v13, %v333_v0 }
  0x13   : > { %v212_v22 = vadd.f32 %v334_v9, %v197_v14  ;;  %v213_v23 = vadd.f32 %v334_v9, %v198_v15  ;;  %v214_v24 = vadd.f32 %v334_v9, %v199_v16  ;;  %v215_v25 = vadd.f32 %v334_v9, %v200_v17 }
  0x14   : > { %v216_v26 = vadd.f32 %v334_v9, %v201_v18  ;;  %v217_v27 = vadd.f32 %v334_v9, %v202_v19  ;;  %v218_v28 = vadd.f32 %v334_v9, %v203_v20  ;;  %v219_v29 = vadd.f32 %v334_v9, %v204_v21 }
  0x15   : > { %v220_v30 = vmax.f32 %v212_v22, 0.0  ;;  %v221_v31 = vmax.f32 %v213_v23, 0.0  ;;  %v222_v32 = vmax.f32 %v214_v24, 0.0  ;;  %v223_v33 = vmax.f32 %v215_v25, 0.0 }
  0x16   : > { %v224_v34 = vmax.f32 %v216_v26, 0.0  ;;  %v225_v35 = vmax.f32 %v217_v27, 0.0  ;;  %v226_v36 = vmax.f32 %v218_v28, 0.0  ;;  %v227_v37 = vmax.f32 %v219_v29, 0.0 }
  0x17   : > { %v372_v38 = vpack.c.bf16 %v221_v31, %v220_v30  ;;  %v377_v39 = vpack.c.bf16 %v223_v33, %v222_v32 }
  0x18   : > { %v382_v40 = vpack.c.bf16 %v225_v35, %v224_v34  ;;  %v387_v41 = vpack.c.bf16 %v227_v37, %v226_v36 }
  0x19   : > { %373 = vst [vmem:[%s172_s25] sm:$0xff] %v372_v38   ;;  %392 = vst [vmem:[%s172_s25 + $0x8] sm:$0xff] %v377_v39  }
  0x1a   : > { %393 = vst [vmem:[%s172_s25 + $0x10] sm:$0xff] %v382_v40   ;;  %394 = vst [vmem:[%s172_s25 + $0x18] sm:$0xff] %v387_v41  }
  0x1b PF: > { %s13_s12 = sadd.s32 1, %s409_s12  }
  0x1c   : > { %p10_p4 = scmp.ge.s32.totalorder %s13_s12, 4  }
  0x1e   :  { %12 = sbr.rel (!%p10_p4) target bundleno = 1 (0x1), region = 62 }

// kernel: pyr_block_forward.4
= control target key start
LH: loop header
LB: loop body
LE: loop exit
PB: predicated region body
PF: predicated region fallthrough
CT: control target
= control target key end

     0   :  { %s729_s15 = smov 0   ;;  %s794_s0 = inlined_call_operand.vmem [shape: bf16[128,128], index: 0, kind: input, shape index: {}]   ;;  %s795_s1 = inlined_call_operand.vmem [shape: bf16[128,128], index: 1, kind: input, shape index: {}]   ;;  %s796_s2 = inlined_call_operand.vmem [shape: bf16[128,128], index: 2, kind: output, shape index: {0}]   ;;  %s797_s3 = inlined_call_operand.vmem [shape: f32[2,1,128], index: 3, kind: output, shape index: {1}]   ;;  %s798_s4 = inlined_call_operand.vmem [shape: f32[2,1,128], index: 4, kind: output, shape index: {2}]  }
   0x1 LB: > { %s735_s16 = sadd.s32 4294967295, %s702_s15   ;;  %p566_p0 = scmp.ge.s32.totalorder %s702_s15, 1  ;;  %s702_s15 = sphi %s729_s15, %s15_s15  }
   0x2   : > { %p168_p1 = scmp.lt.s32.totalorder %s702_s15, 3 }
   0x4   : > { %p169_p2 = pnand %p566_p0, %p168_p1 }
   0x5   : > { %s567_s19 = sshll.u32 (!%p169_p2), %s735_s16, 3  ;;  %p212_p4 = scmp.lt.s32.totalorder (!%p169_p2), %s735_s16, 1 }
   0x6   : > { %172 = sbr.rel (%p169_p2) target bundleno = 272 (0x110), region = 28  ;;  %p201_p3 = scmp.lt.s32.totalorder (!%p169_p2), %s567_s19, 15 }
   0xb   : > { %v684_v0 = vld [vmem:[%s795_s1 + $0x38] sm:$0xff]   ;;  %v685_v1 = vld [vmem:[%s795_s1 + $0x30] sm:$0xff]   ;;  %s800_s19 = smov (!%p201_p3, %s567_s19), 15  ;;  %v686_v2 = vld [vmem:[%s795_s1 + $0x28] sm:$0xff]   ;;  %s802_s16 = smov (!%p212_p4, %s735_s16), 1 }
   0xc   : > { %636 = vmatprep.subr.bf16.mxu0 %v684_v0  ;;  %660 = vmatprep.subr.bf16.mxu1 %v684_v0  ;;  %s568_s24 = sshll.u32 %s800_s19, 2  ;;  %v687_v3 = vld [vmem:[%s795_s1 + $0x20] sm:$0xff]   ;;  %v688_v6 = vld [vmem:[%s795_s1 + $0x18] sm:$0xff]   ;;  %v689_v7 = vld [vmem:[%s795_s1 + $0x10] sm:$0xff]   ;;  %s214_s19 = scalar_lea.vmem %s797_s3, %s802_s16 }
   0xd   : > { %637 = vmatpush3.bf16.msra.mxu0 %v684_v0  ;;  %668 = vmatpush3.bf16.msra.mxu1 %v684_v0  ;;  %s757_s27 = scalar_lea.vmem %s794_s0, %s568_s24  ;;  %v690_v8 = vld [vmem:[%s795_s1 + $0x8] sm:$0xff]   ;;  %v691_v9 = vld [vmem:[%s795_s1] sm:$0xff]   ;;  %s210_s14 = scalar_lea.vmem %s796_s2, %s568_s24 }
   0xe   : > { %638 = vmatprep.subr.bf16.mxu0 %v685_v1  ;;  %661 = vmatprep.subr.bf16.mxu1 %v685_v1  ;;  %v692_v4 = vld [vmem:[%s757_s27] sm:$0xff]   ;;  %v694_v5 = vld [vmem:[%s757_s27 + $0x10] sm:$0xff]   ;;  %v693_v10 = vld [vmem:[%s757_s27 + $0x8] sm:$0xff]   ;;  %s217_s22 = scalar_lea.vmem %s798_s4, %s802_s16 }
   0xf   : > { %652 = vmatprep.mubr.bf16.mxu0 %v692_v4  ;;  %656 = vmatprep.mubr.bf16.mxu1 %v694_v5  ;;  %v695_v11 = vld [vmem:[%s757_s27 + $0x18] sm:$0xff]  }
  0x11   : > { %639 = vmatpush3.bf16.msra.mxu0 %v685_v1  ;;  %669 = vmatpush3.bf16.msra.mxu1 %v685_v1 }
  0x12   : > { %640 = vmatprep.subr.bf16.mxu0 %v686_v2  ;;  %662 = vmatprep.subr.bf16.mxu1 %v686_v2 }
  0x15   : > { %641 = vmatpush3.bf16.msra.mxu0 %v686_v2  ;;  %670 = vmatpush3.bf16.msra.mxu1 %v686_v2 }
  0x16   : > { %642 = vmatprep.subr.bf16.mxu0 %v687_v3  ;;  %663 = vmatprep.subr.bf16.mxu1 %v687_v3 }
  0x19   : > { %643 = vmatpush3.bf16.msra.mxu0 %v687_v3  ;;  %671 = vmatpush3.bf16.msra.mxu1 %v687_v3 }
  0x1a   : > { %644 = vmatprep.subr.bf16.mxu0 %v688_v6  ;;  %664 = vmatprep.subr.bf16.mxu1 %v688_v6 }
  0x1d   : > { %645 = vmatpush3.bf16.msra.mxu0 %v688_v6  ;;  %672 = vmatpush3.bf16.msra.mxu1 %v688_v6 }
  0x1e   : > { %646 = vmatprep.subr.bf16.mxu0 %v689_v7  ;;  %665 = vmatprep.subr.bf16.mxu1 %v689_v7 }
  0x21   : > { %647 = vmatpush3.bf16.msra.mxu0 %v689_v7  ;;  %673 = vmatpush3.bf16.msra.mxu1 %v689_v7 }
  0x22   : > { %648 = vmatprep.subr.bf16.mxu0 %v690_v8  ;;  %666 = vmatprep.subr.bf16.mxu1 %v690_v8 }
  0x25   : > { %649 = vmatpush3.bf16.msra.mxu0 %v690_v8  ;;  %674 = vmatpush3.bf16.msra.mxu1 %v690_v8 }
  0x26   : > { %650 = vmatprep.subr.bf16.mxu0 %v691_v9  ;;  %667 = vmatprep.subr.bf16.mxu1 %v691_v9 }
  0x29   : > { %651 = vmatpush3.bf16.msra.mxu0 %v691_v9  ;;  %675 = vmatpush3.bf16.msra.mxu1 %v691_v9 }
  0x2c   : > { %653 = vmatmul.mubr.bf16.vlgmr.msra.gmra.mxu0 %v693_v10  ;;  %657 = vmatmul.mubr.bf16.vlgmr.msra.gmra.mxu1 %v695_v11 }
  0xec   : > { %v654_v12 = vpop.f32.mrf.mxu0  ;;  %v658_v13 = vpop.f32.mrf.mxu1 }
  0xed   : > { %v436_v27 = vmul.f32 %v654_v12, %v654_v12  ;;  %v440_v39 = vmul.f32 %v658_v13, %v658_v13 }
  0xee   : > { %v349_v14 = vpop.f32.mrf.mxu0  ;;  %v365_v15 = vpop.f32.mrf.mxu1 }
  0xef   : > { %v434_v20 = vmul.f32 %v349_v14, %v349_v14  ;;  %v438_v33 = vmul.f32 %v365_v15, %v365_v15 }
  0xf0   : > { %v655_v16 = vpop.f32.mrf.mxu0  ;;  %v659_v17 = vpop.f32.mrf.mxu1 }
  0xf1   : > { %v609_v18 = vpack.c.bf16 %v655_v16, %v654_v12  ;;  %v619_v19 = vpack.c.bf16 %v659_v17, %v658_v13  ;;  %v437_v30 = vmul.f32 %v655_v16, %v655_v16  ;;  %v441_v42 = vmul.f32 %v659_v17, %v659_v17 }
  0xf2   : > { %v352_v21 = vpop.f32.mrf.mxu0  ;;  %v368_v22 = vpop.f32.mrf.mxu1 }
  0xf3   : > { %621 = vst [vmem:[%s210_s14 + $0x8] sm:$0xff] %v609_v18   ;;  %v604_v23 = vpack.c.bf16 %v352_v21, %v349_v14  ;;  %v420_v24 = vadd.f32 %v352_v21, %v349_v14  ;;  %v435_v25 = vmul.f32 %v352_v21, %v352_v21  ;;  %623 = vst [vmem:[%s210_s14 + $0x18] sm:$0xff] %v619_v19  }
  0xf4   : > { %v614_v26 = vpack.c.bf16 %v368_v22, %v365_v15  ;;  %v439_v37 = vmul.f32 %v368_v22, %v368_v22 }
  0xf5   : > { %605 = vst [vmem:[%s210_s14] sm:$0xff] %v604_v23   ;;  %v421_v28 = vadd.f32 %v654_v12, %v420_v24  ;;  %v442_v29 = vadd.f32 %v435_v25, %v434_v20 }
  0xf6   : > { %622 = vst [vmem:[%s210_s14 + $0x10] sm:$0xff] %v614_v26  }
  0xf7   : > { %v443_v31 = vadd.f32 %v442_v29, %v436_v27  ;;  %v422_v32 = vadd.f32 %v655_v16, %v421_v28 }
  0xf9   : > { %v423_v34 = vadd.f32 %v422_v32, %v365_v15  ;;  %v444_v35 = vadd.f32 %v443_v31, %v437_v30 }
  0xfb   : > { %v424_v36 = vadd.f32 %v423_v34, %v368_v22  ;;  %v445_v38 = vadd.f32 %v444_v35, %v438_v33 }
  0xfd   : > { %v425_v40 = vadd.f32 %v658_v13, %v424_v36  ;;  %v446_v41 = vadd.f32 %v445_v38, %v439_v37 }
  0xff   : > { %v426_v43 = vadd.f32 %v659_v17, %v425_v40  ;;  %v447_v44 = vadd.f32 %v446_v41, %v440_v39 }
 0x101   : > { %v427_v45 = vrot.slane %v426_v43, 4  ;;  %v448_v46 = vadd.f32 %v447_v44, %v441_v42 }
 0x103   : > { %v428_v47 = vadd.f32 %v427_v45, %v426_v43  ;;  %v449_v48 = vrot.slane %v448_v46, 4 }
 0x105   : > { %v429_v49 = vrot.slane %v428_v47, 2  ;;  %v450_v50 = vadd.f32 %v449_v48, %v448_v46 }
 0x107   : > { %v430_v51 = vadd.f32 %v429_v49, %v428_v47  ;;  %v451_v52 = vrot.slane %v450_v50, 2 }
 0x109   : > { %v431_v53 = vrot.slane %v430_v51, 1  ;;  %v452_v54 = vadd.f32 %v451_v52, %v450_v50 }
 0x10b   : > { %v432_v55 = vadd.f32 %v431_v53, %v430_v51  ;;  %v453_v56 = vrot.slane %v452_v54, 1 }
 0x10d   : > { %433 = vst [vmem:[%s214_s19] sm:$0x1] %v432_v55  ;;  %v454_v57 = vadd.f32 %v453_v56, %v452_v54 }
 0x10f   : > { %455 = vst [vmem:[%s217_s22] sm:$0x1] %v454_v57 }
 0x110 PF: > { %s15_s15 = sadd.s32 1, %s702_s15  }
 0x111   : > { %p12_p5 = scmp.ge.s32.totalorder %s15_s15, 4  }
 0x113   :  { %14 = sbr.rel (!%p12_p5) target bundleno = 1 (0x1), region = 82 }

// kernel: pyr_block_forward.7
= control target key start
LH: loop header
LB: loop body
LE: loop exit
PB: predicated region body
PF: predicated region fallthrough
CT: control target
= control target key end

     0   :  { %s471_s15 = smov 0   ;;  %s501_s0 = inlined_call_operand.vmem [shape: bf16[128,128], index: 0, kind: input, shape index: {}]   ;;  %s502_s1 = inlined_call_operand.vmem [shape: bf16[128,128], index: 1, kind: input, shape index: {}]   ;;  %s503_s2 = inlined_call_operand.vmem [shape: f32[1,128], index: 2, kind: input, shape index: {}]   ;;  %s504_s3 = inlined_call_operand.vmem [shape: f32[1,128], index: 3, kind: input, shape index: {}]   ;;  %s505_s4 = inlined_call_operand.vmem [shape: f32[128,128], index: 4, kind: output, shape index: {}]  }
   0x1 LB: > { %s377_s16 = sadd.s32 4294967295, %s444_s15   ;;  %p381_p0 = scmp.ge.s32.totalorder %s444_s15, 1  ;;  %s444_s15 = sphi %s471_s15, %s14_s15  }
   0x2   : > { %p174_p1 = scmp.lt.s32.totalorder %s444_s15, 3 }
   0x4   : > { %p175_p2 = pnand %p381_p0, %p174_p1 }
   0x5   : > { %s382_s17 = sshll.u32 (!%p175_p2), %s377_s16, 3 }
   0x6   : > { %178 = sbr.rel (%p175_p2) target bundleno = 33 (0x21), region = 36  ;;  %p206_p3 = scmp.lt.s32.totalorder (!%p175_p2), %s382_s17, 15 }
   0xb   : > { %s507_s17 = smov (!%p206_p3, %s382_s17), 15  ;;  %v388_v0 = vld [vmem:[%s503_s2] ss:$0 sm:$0xff] }
   0xc   : > { %s383_s18 = sshll.u32 %s507_s17, 2  ;;  %v389_v11 = vld [vmem:[%s504_s3] ss:$0 sm:$0xff]  ;;  %s387_s29 = sshll.u32 %s507_s17, 3 }
   0xd   : > { %s209_s21 = scalar_lea.vmem %s501_s0, %s383_s18  ;;  %s215_s24 = scalar_lea.vmem %s502_s1, %s383_s18 }
   0xe   : > { %v393_v1 = vld [vmem:[%s209_s21] sm:$0xff]   ;;  %v424_v3 = vld [vmem:[%s209_s21 + $0x8] sm:$0xff]   ;;  %v425_v9 = vld [vmem:[%s209_s21 + $0x10] sm:$0xff]   ;;  %s221_s6 = scalar_lea.vmem %s505_s4, %s387_s29 }
   0xf   : > { %v409_v2 = vld [vmem:[%s215_s24] sm:$0xff]   ;;  %v394_v4 = vunpack.c.l.bf16 %v393_v1  ;;  %v395_v6 = vunpack.c.h.bf16 %v393_v1  ;;  %v427_v8 = vld [vmem:[%s215_s24 + $0x8] sm:$0xff]   ;;  %v428_v10 = vld [vmem:[%s215_s24 + $0x10] sm:$0xff]   ;;  %v398_v12 = vunpack.c.l.bf16 %v424_v3  ;;  %v399_v14 = vunpack.c.h.bf16 %v424_v3 }
  0x10   : > { %v410_v5 = vunpack.c.l.bf16 %v409_v2  ;;  %v411_v7 = vunpack.c.h.bf16 %v409_v2  ;;  %v414_v13 = vunpack.c.l.bf16 %v427_v8  ;;  %v415_v15 = vunpack.c.h.bf16 %v427_v8  ;;  %v426_v16 = vld [vmem:[%s209_s21 + $0x18] sm:$0xff]  }
  0x11   : > { %v246_v17 = vmul.f32 %v394_v4, %v388_v0  ;;  %v247_v18 = vmul.f32 %v395_v6, %v388_v0  ;;  %v402_v19 = vunpack.c.l.bf16 %v425_v9  ;;  %v418_v20 = vunpack.c.l.bf16 %v428_v10  ;;  %v429_v21 = vld [vmem:[%s215_s24 + $0x18] sm:$0xff]  }
  0x12   : > { %v248_v22 = vmul.f32 %v398_v12, %v388_v0  ;;  %v249_v23 = vmul.f32 %v399_v14, %v388_v0  ;;  %v403_v24 = vunpack.c.h.bf16 %v425_v9  ;;  %v419_v25 = vunpack.c.h.bf16 %v428_v10 }
  0x13   : > { %v261_v26 = vadd.f32 %v389_v11, %v246_v17  ;;  %v262_v27 = vadd.f32 %v389_v11, %v247_v18  ;;  %v250_v28 = vmul.f32 %v402_v19, %v388_v0  ;;  %v406_v29 = vunpack.c.l.bf16 %v426_v16 }
  0x14   : > { %v263_v30 = vadd.f32 %v389_v11, %v248_v22  ;;  %v264_v31 = vadd.f32 %v389_v11, %v249_v23  ;;  %v251_v32 = vmul.f32 %v403_v24, %v388_v0  ;;  %v422_v33 = vunpack.c.l.bf16 %v429_v21 }
  0x15   : > { %v285_v34 = vadd.f32 %v410_v5, %v261_v26  ;;  %v286_v35 = vadd.f32 %v411_v7, %v262_v27  ;;  %v265_v36 = vadd.f32 %v389_v11, %v250_v28  ;;  %v252_v37 = vmul.f32 %v406_v29, %v388_v0 }
  0x16   : > { %v287_v38 = vadd.f32 %v414_v13, %v263_v30  ;;  %v288_v39 = vadd.f32 %v415_v15, %v264_v31  ;;  %v266_v40 = vadd.f32 %v389_v11, %v251_v32  ;;  %v407_v41 = vunpack.c.h.bf16 %v426_v16 }
  0x17   : > { %v293_v42 = vmax.f32 %v285_v34, 0.0  ;;  %v294_v43 = vmax.f32 %v286_v35, 0.0  ;;  %v289_v44 = vadd.f32 %v418_v20, %v265_v36  ;;  %v267_v45 = vadd.f32 %v389_v11, %v252_v37 }
  0x18   : > { %v295_v46 = vmax.f32 %v287_v38, 0.0  ;;  %v296_v47 = vmax.f32 %v288_v39, 0.0  ;;  %v290_v48 = vadd.f32 %v419_v25, %v266_v40  ;;  %v253_v49 = vmul.f32 %v407_v41, %v388_v0 }
  0x19   : > { %301 = vst [vmem:[%s221_s6] sm:$0xff] %v293_v42  ;;  %302 = vst [vmem:[%s221_s6 + $0x8] sm:$0xff] %v294_v43  ;;  %v297_v50 = vmax.f32 %v289_v44, 0.0  ;;  %v291_v51 = vadd.f32 %v422_v33, %v267_v45  ;;  %v423_v52 = vunpack.c.h.bf16 %v429_v21 }
  0x1a   : > { %303 = vst [vmem:[%s221_s6 + $0x10] sm:$0xff] %v295_v46  ;;  %304 = vst [vmem:[%s221_s6 + $0x18] sm:$0xff] %v296_v47  ;;  %v298_v53 = vmax.f32 %v290_v48, 0.0  ;;  %v268_v54 = vadd.f32 %v389_v11, %v253_v49 }
  0x1b   : > { %305 = vst [vmem:[%s221_s6 + $0x20] sm:$0xff] %v297_v50  ;;  %v299_v55 = vmax.f32 %v291_v51, 0.0 }
  0x1c   : > { %306 = vst [vmem:[%s221_s6 + $0x28] sm:$0xff] %v298_v53  ;;  %v292_v56 = vadd.f32 %v423_v52, %v268_v54 }
  0x1d   : > { %307 = vst [vmem:[%s221_s6 + $0x30] sm:$0xff] %v299_v55 }
  0x1e   : > { %v300_v57 = vmax.f32 %v292_v56, 0.0 }
  0x20   : > { %308 = vst [vmem:[%s221_s6 + $0x38] sm:$0xff] %v300_v57 }
  0x21 PF: > { %s14_s15 = sadd.s32 1, %s444_s15  }
  0x22   : > { %p11_p4 = scmp.ge.s32.totalorder %s14_s15, 4  }
  0x24   :  { %13 = sbr.rel (!%p11_p4) target bundleno = 1 (0x1), region = 69 }

</bundles_post_ra>
